<compile_context>
chip_gen: v5e
topology: v5e:2x2
jax: 0.10.0
libtpu: 0.0.40
codegen_flags: <defaults>
</compile_context>

<pallas_src>
import math
import functools

import jax
import jax.numpy as jnp
from jax.experimental import pallas as pl
from jax.experimental.pallas import tpu as pltpu


def _make_pe(max_len: int, d_model: int) -> jnp.ndarray:
    """Sin/cos positional-encoding buffer, identical to the PyTorch __init__."""
    position = jnp.arange(0, max_len, dtype=jnp.float32)[:, None]          # (L, 1)
    div_term = jnp.exp(
        jnp.arange(0, d_model, 2, dtype=jnp.float32)
        * (-(math.log(10000.0) / d_model))
    )                                                                       # (D/2,)
    angles = position * div_term                                            # (L, D/2)
    pe = jnp.zeros((max_len, d_model), dtype=jnp.float32)
    pe = pe.at[:, 0::2].set(jnp.sin(angles))
    pe = pe.at[:, 1::2].set(jnp.cos(angles))
    return pe[None, :, :]                                                   # (1, L, D)


def _add_pe_kernel(x_ref, pe_ref, o_ref):
    # x_ref: (B, TC)   pe_ref: (1, TC)   o_ref: (B, TC)
    y = x_ref[...].astype(jnp.float32) + pe_ref[...].astype(jnp.float32)
    o_ref[...] = y.astype(o_ref.dtype)


def _add_pe_dropout_kernel(x_ref, pe_ref, bits_ref, o_ref, *, keep_prob: float):
    # Inverted dropout: keep iff bits < keep_prob * 2^32, scale kept by 1/keep_prob.
    y = x_ref[...].astype(jnp.float32) + pe_ref[...].astype(jnp.float32)
    thresh = jnp.uint32(min(int(round(keep_prob * 4294967296.0)), 4294967295))
    keep = bits_ref[...] < thresh
    o_ref[...] = jnp.where(keep, y * (1.0 / keep_prob), 0.0).astype(o_ref.dtype)


def _pick_col_tile(n_cols: int, n_rows: int, max_tile_bytes: int) -> int:
    """Largest multiple-of-128 divisor of n_cols with n_rows*TC*4 <= max_tile_bytes."""
    assert n_cols % 128 == 0
    m = n_cols // 128
    target = max(1, min(m, max_tile_bytes // (4 * max(1, n_rows)) // 128))
    best = 1
    d = 1
    while d * d <= m:
        if m % d == 0:
            if d <= target:
                best = max(best, d)
            q = m // d
            if q <= target:
                best = max(best, q)
        d += 1
    return 128 * best


def positional_encoding_forward(x, pe, *, dropout_p: float = 0.0,
                                training: bool = False, rng_key=None,
                                max_tile_bytes: int = 1 << 20):
    """x: (B, S, D); pe: (1, max_len, D) buffer from _make_pe."""
    B, S, D = x.shape
    _, max_len, D_pe = pe.shape
    assert D_pe == D and S <= max_len, "bad pe buffer / sequence too long"

    N = S * D
    x2 = x.reshape(B, N)                        # lane-dense view (metadata only)

    if N % 128 == 0:
        tc = _pick_col_tile(N, B, max_tile_bytes)
        # Full pe buffer; BlockSpec picks the [: S*D] column tiles, the rest of
        # max_len is never fetched from HBM.
        pe_in = pe.reshape(1, max_len * D)
    else:
        # Rare fallback: one full-width block; needs a pe slice so the block
        # shape equals the (sliced) array's last dim.
        tc = N
        pe_in = jax.lax.slice(pe.reshape(1, max_len * D), (0, 0), (1, N))

    grid = (N // tc,)

    use_dropout = training and dropout_p > 0.0
    keep_prob = 1.0 - dropout_p

    itemsize = jnp.dtype(x.dtype).itemsize
    bytes_accessed = B * N * itemsize * 2 + N * 4
    if use_dropout:
        bytes_accessed += B * N * 4
    cost = pl.CostEstimate(flops=B * N, transcendentals=0,
                           bytes_accessed=bytes_accessed)

    x_spec = pl.BlockSpec((B, tc), lambda c: (0, c))
    pe_spec = pl.BlockSpec((1, tc), lambda c: (0, c))
    out_spec = pl.BlockSpec((B, tc), lambda c: (0, c))

    if use_dropout:
        if rng_key is None:
            rng_key = jax.random.PRNGKey(0)
        bits = jax.random.bits(rng_key, (B, N), dtype=jnp.uint32)
        kernel = functools.partial(_add_pe_dropout_kernel, keep_prob=keep_prob)
        in_specs = [x_spec, pe_spec, pl.BlockSpec((B, tc), lambda c: (0, c))]
        operands = (x2, pe_in, bits)
    else:
        kernel = _add_pe_kernel
        in_specs = [x_spec, pe_spec]
        operands = (x2, pe_in)

    out2 = pl.pallas_call(
        kernel,
        out_shape=jax.ShapeDtypeStruct((B, N), x.dtype),
        grid=grid,
        in_specs=in_specs,
        out_specs=out_spec,
        compiler_params=pltpu.CompilerParams(
            dimension_semantics=("parallel",),
        ),
        cost_estimate=cost,
    )(*operands)

    return out2.reshape(B, S, D)


if __name__ == "__main__":
    d_model = 32
    max_len = 64
    batch = 2
    seq = 8
    dropout_p = 0.1

    key = jax.random.PRNGKey(0)
    kx, kd = jax.random.split(key)
    x = jax.random.normal(kx, (batch, seq, d_model), dtype=jnp.float32)

    pe = _make_pe(max_len, d_model)
    ref = x + pe[:, :seq, :]

    # Eval-mode forward (dropout is identity) -- deterministic path.
    out_eval = jax.block_until_ready(
        positional_encoding_forward(x, pe, dropout_p=dropout_p, training=False))
    assert out_eval.shape == x.shape
    assert jnp.allclose(out_eval, ref, atol=1e-6), "eval-mode mismatch vs reference"

    # Same, but forcing a tiny column tile so the multi-step grid / tiled-pe
    # index_map path is exercised too.
    out_tiled = jax.block_until_ready(
        positional_encoding_forward(x, pe, dropout_p=dropout_p, training=False,
                                    max_tile_bytes=batch * 128 * 4))
    assert jnp.allclose(out_tiled, ref, atol=1e-6), "tiled eval mismatch vs reference"

    # Training-mode forward exercises the in-kernel dropout path.
    out_train = jax.block_until_ready(
        positional_encoding_forward(x, pe, dropout_p=dropout_p, training=True,
                                    rng_key=kd))
    assert out_train.shape == x.shape
    # Every element is either dropped (exactly 0) or equals (x+pe)/keep_prob.
    scaled = ref / (1.0 - dropout_p)
    ok = (out_train == 0.0) | (jnp.abs(out_train - scaled) < 1e-4)
    assert bool(jnp.all(ok)), "dropout-mode values inconsistent with inverted dropout"

    print("KERNEL_OK")
</pallas_src>

<mosaic_0001>
module attributes {stable_mosaic.version = 11 : i64} {
  func.func @_add_pe_kernel(%arg0: i32, %arg1: memref<2x256xf32, #tpu.memory_space<vmem>>, %arg2: memref<1x256xf32, #tpu.memory_space<vmem>>, %arg3: memref<2x256xf32, #tpu.memory_space<vmem>>) attributes {dimension_semantics = [#tpu.dimension_semantics<parallel>], iteration_bounds = array<i64: 1>, scalar_prefetch = 0 : i64, scratch_operands = 0 : i64, tpu.core_type = #tpu.core_type<tc>, window_params = [{transform_indices = @transform_0, window_bounds = array<i64: 2, 256>}, {transform_indices = @transform_1, window_bounds = array<i64: 1, 256>}, {transform_indices = @transform_2, window_bounds = array<i64: 2, 256>}]} {
    %c0 = arith.constant 0 : index
    %c0_0 = arith.constant 0 : index
    %0 = vector.load %arg1[%c0, %c0_0] : memref<2x256xf32, #tpu.memory_space<vmem>>, vector<2x256xf32>
    %c0_1 = arith.constant 0 : index
    %c0_2 = arith.constant 0 : index
    %1 = vector.load %arg2[%c0_1, %c0_2] : memref<1x256xf32, #tpu.memory_space<vmem>>, vector<1x256xf32>
    %2 = vector.broadcast %1 : vector<1x256xf32> to vector<2x256xf32>
    %3 = arith.addf %0, %2 : vector<2x256xf32>
    %c0_3 = arith.constant 0 : index
    %c0_4 = arith.constant 0 : index
    %4 = vector.load %arg3[%c0_3, %c0_4] : memref<2x256xf32, #tpu.memory_space<vmem>>, vector<2x256xf32>
    tpu.vector_store %arg3[%c0_3, %c0_4], %3 {strides = array<i32>} : memref<2x256xf32, #tpu.memory_space<vmem>>, vector<2x256xf32>,
    return
  }
  func.func @transform_0(%arg0: i32) -> (i32, i32) {
    %c0_i32 = arith.constant 0 : i32
    %c0_i32_0 = arith.constant 0 : i32
    return %c0_i32, %arg0 : i32, i32
  }
  func.func @transform_1(%arg0: i32) -> (i32, i32) {
    %c0_i32 = arith.constant 0 : i32
    %c0_i32_0 = arith.constant 0 : i32
    return %c0_i32, %arg0 : i32, i32
  }
  func.func @transform_2(%arg0: i32) -> (i32, i32) {
    %c0_i32 = arith.constant 0 : i32
    %c0_i32_0 = arith.constant 0 : i32
    return %c0_i32, %arg0 : i32, i32
  }
}

</mosaic_0001>

<bundles_post_ra>
// kernel: tpu_custom_call.1
= control target key start
LH: loop header
LB: loop body
LE: loop exit
PB: predicated region body
PF: predicated region fallthrough
CT: control target
= control target key end

     0   :  { %7 = vsyncpa [#allocation3], 0  ;;  %s177_s0 = inlined_call_operand.hbm [shape: f32[2,256], index: 0, kind: input, shape index: {}]   ;;  %s178_s1 = inlined_call_operand.hbm [shape: f32[1,2048], index: 1, kind: input, shape index: {}]   ;;  %s179_s2 = inlined_call_operand.hbm [shape: f32[2,256], index: 2, kind: output, shape index: {}]  }
   0x1   :  { %8 = vsyncpa [#allocation6], 0 }
   0x2   :  { %9 = vsyncpa [#allocation4], 0  ;;  %s15_s11 = sshll.u32 %s177_s0, 4  ;;  %s150_s12 = smov [#allocation2]   ;;  %s16_s11 = int_to_ptr.hbm [resolvable:$true] %s15_s11 }
   0x3   :  { %s17_s13 = sshll.u32 %s150_s12, 4  ;;  %s26_s16 = sshll.u32 %s178_s1, 4  ;;  %s18_s13 = int_to_ptr.vmem [resolvable:$true] %s17_s13  ;;  %s27_s16 = int_to_ptr.hbm [resolvable:$true] %s26_s16 }
   0x4   :  { %20 = dma.hbm_to_vmem [thread:$0]  %s16_s11, 64, %s18_s13, [#allocation3]  }
   0x5   :  { %s151_s17 = smov [#allocation5]  }
   0x6   :  { %s28_s18 = sshll.u32 %s151_s17, 4  ;;  %s29_s18 = int_to_ptr.vmem [resolvable:$true] %s28_s18 }
   0x7   :  { %31 = dma.hbm_to_vmem [thread:$0]  %s27_s16, 32, %s29_s18, [#allocation6]  }
   0x8   :  { %144 = dma.done.wait [#allocation3], 64  }
   0x9   :  { %145 = vsyncadd [#allocation3], 4294967232 }
   0xa   :  { %146 = dma.done.wait [#allocation6], 32  }
   0xb   :  { %147 = vsyncadd [#allocation6], 4294967264  ;;  %v41_v0 = vld [vmem:[#allocation5] sm:$0x3]  ;;  %vm46_vm0 = vcmask 1041408   ;;  %s152_s0 = smov [#allocation7]  }
   0xc   :  { %v43_v1 = vperm.slane %v41_v0, 0  ;;  %v44_v2 = vperm.slane %v41_v0, 1  ;;  %v40_v3 = vld [vmem:[#allocation2] sm:$0xf]  ;;  %s56_s19 = sshll.u32 %s152_s0, 4  ;;  %s58_s21 = sshll.u32 %s179_s2, 4  ;;  %s57_s19 = int_to_ptr.vmem [resolvable:$true] %s56_s19  ;;  %s59_s21 = int_to_ptr.hbm [resolvable:$true] %s58_s21 }
   0xe   :  { %v45_v4 = vrot.slane %v44_v2, 6 }
  0x10   :  { %v47_v5 = vsel %vm46_vm0, %v43_v1, %v45_v4 }
  0x11   :  { %v49_v6 = vadd.f32 %v47_v5, %v40_v3 }
  0x13   :  { %50 = vst [vmem:[#allocation7] sm:$0xf] %v49_v6 }
  0x14   :  { %61 = dma.vmem_to_hbm [thread:$0]  %s57_s19, 64, %s59_s21, [#allocation4]  }
  0x15   :  { %148 = dma.done.wait [#allocation4], 64  }
  0x16   :  { %149 = vsyncadd [#allocation4], 4294967232 }
  0x17   :  { %66 = vsyncpa [#allocation3], 1 }
  0x18   :  { %67 = vsyncpa [#allocation6], 1 }
  0x19   :  { %68 = vsyncpa [#allocation4], 1 }

</bundles_post_ra>
